<compile_context>
chip_gen: v5e
topology: v5e:2x2
jax: 0.10.0
libtpu: 0.0.40
codegen_flags: <defaults>
</compile_context>

<pallas_src>
import jax
import jax.numpy as jnp
from jax.experimental import pallas as pl
from jax.experimental.pallas import tpu as pltpu


def siamese_kernel(x1_ref, x2_ref, w1_ref, b1_ref, w2_ref, b2_ref, out_ref):
    # Elementwise hot path (VPU)
    a = x1_ref[...] - x2_ref[...]                    # (TB, 128)
    xcat = jnp.concatenate([a, a * a], axis=-1)      # (TB, 256), lane-adjacent

    # fc1 as a single K=256 matmul (fills the 256-deep MXU on v6e/v7x).
    h = jnp.dot(xcat, w1_ref[...], preferred_element_type=jnp.float32) + b1_ref[...]
    h = jnp.maximum(h, 0.0)                          # ReLU, (TB, 64)

    # fc3, lane-dense: (8, 64) @ (TB, 64)^T -> (8, TB); batch lands on the
    # LANE axis so the store is wide/unmasked.  The 8 rows of w2 are identical
    # replicas; only row 0 is sigmoid-ed and written (8x less writeback/EUP).
    # (Mem-bound kernel: even if Mosaic inserts a transpose of h for the
    #  transposed-RHS contraction it is hidden under the input DMA.)
    z = jax.lax.dot_general(
        w2_ref[...], h,
        (((1,), (1,)), ((), ())),
        preferred_element_type=jnp.float32,
    )                                                # (8, TB)
    out_ref[...] = jax.nn.sigmoid(z[0:1, :] + b2_ref[0])[None]   # (1, 1, TB)


def _round_up(n, m):
    return (n + m - 1) // m * m


def siamese_part(x1, x2, w1_t, b1, w2_t, b2, *, block_b=4096):
    """x1, x2: (B, 128) float32. Returns (B,) float32 (squeezed sigmoid score)."""
    B, F = x1.shape
    assert F == 128 and w1_t.shape == (256, 64) and w2_t.shape == (64, 1)
    assert b1.shape == (64,) and b2.shape == (1,)

    # Batch tile: multiple of 128 (lane-dense output stores), sized so the
    # grid has >= 2 steps when possible (v7x megacore), capped at block_b so
    # VMEM does not scale with B.  No input padding: the tail block is partial
    # and its garbage rows are dropped by the final [:B] slice.
    TB = min(block_b, _round_up(pl.cdiv(B, 2), 128))
    grid_b = pl.cdiv(B, TB)

    b1_row = b1.reshape(1, 64)
    # fc3 weight as a lane-major row, replicated to 8 sublanes so the last
    # layer is a plain NT matmul with a native sublane count.
    w2_rows = jnp.tile(w2_t.reshape(1, 64), (8, 1))                 # (8, 64)

    cost = pl.CostEstimate(
        flops=2 * B * 256 * 64 + 2 * B * 64 * 8,
        transcendentals=B,
        bytes_accessed=B * (2 * F + 1) * 4 + (256 * 64 + 64 + 8 * 64 + 1) * 4,
    )

    out3 = pl.pallas_call(
        siamese_kernel,
        out_shape=jax.ShapeDtypeStruct((grid_b, 1, TB), jnp.float32),
        grid=(grid_b,),
        in_specs=[
            pl.BlockSpec((TB, F), lambda i: (i, 0)),               # x1 tile
            pl.BlockSpec((TB, F), lambda i: (i, 0)),               # x2 tile
            pl.BlockSpec((256, 64), lambda i: (0, 0)),             # fc1 weight (VMEM resident)
            pl.BlockSpec((1, 64), lambda i: (0, 0)),               # fc1 bias   (VMEM resident)
            pl.BlockSpec((8, 64), lambda i: (0, 0)),               # fc3 weight rows
            pl.BlockSpec(memory_space=pltpu.MemorySpace.SMEM),     # fc3 bias scalar
        ],
        out_specs=pl.BlockSpec((1, 1, TB), lambda i: (i, 0, 0)),
        compiler_params=pltpu.CompilerParams(
            dimension_semantics=("parallel",),      # megacore sharding on v7x
            vmem_limit_bytes=32 * 1024 * 1024,
        ),
        cost_estimate=cost,
    )(x1, x2, w1_t, b1_row, w2_rows, b2)

    # Batch is on the lane axis of each (1, TB) block: a free reshape flattens
    # it in row order; drop tail lanes past B (PyTorch squeeze(-1) glue).
    return out3.reshape(-1)[:B]


def init_params(key):
    # Deterministic synthetic init mimicking PyTorch Linear's U(-1/sqrt(fan_in), 1/sqrt(fan_in))
    k1, k2, k3, k4 = jax.random.split(key, 4)
    lim1 = 1.0 / jnp.sqrt(256.0)
    lim2 = 1.0 / jnp.sqrt(64.0)
    w1_t = jax.random.uniform(k1, (256, 64), jnp.float32, -lim1, lim1)  # fc1 weight^T
    b1 = jax.random.uniform(k2, (64,), jnp.float32, -lim1, lim1)
    w2_t = jax.random.uniform(k3, (64, 1), jnp.float32, -lim2, lim2)    # fc3 weight^T
    b2 = jax.random.uniform(k4, (1,), jnp.float32, -lim2, lim2)
    return w1_t, b1, w2_t, b2


def reference(x1, x2, w1_t, b1, w2_t, b2):
    a = x1 - x2
    x = jnp.concatenate([a, a * a], axis=-1)
    x = jax.nn.relu(x @ w1_t + b1)
    x = jax.nn.sigmoid(x @ w2_t + b2)
    return jnp.squeeze(x, axis=-1)


if __name__ == "__main__":
    key = jax.random.PRNGKey(0)
    kp, kx1, kx2, kx3, kx4 = jax.random.split(key, 5)
    w1_t, b1, w2_t, b2 = init_params(kp)

    # Small primary check (single partial tile: B=8 < TB=128).
    B = 8
    x1 = jax.random.normal(kx1, (B, 128), jnp.float32)
    x2 = jax.random.normal(kx2, (B, 128), jnp.float32)
    out = jax.block_until_ready(siamese_part(x1, x2, w1_t, b1, w2_t, b2))
    ref = reference(x1, x2, w1_t, b1, w2_t, b2)
    assert out.shape == (B,)
    assert jnp.allclose(out, ref, atol=1e-5, rtol=1e-5), (out, ref)

    # Second check: multi-step batch grid with a ragged (partial) tail block
    # and lane-dense 128-wide output tiles, no input padding.
    B2 = 300
    y1 = jax.random.normal(kx3, (B2, 128), jnp.float32)
    y2 = jax.random.normal(kx4, (B2, 128), jnp.float32)
    out2 = jax.block_until_ready(siamese_part(y1, y2, w1_t, b1, w2_t, b2, block_b=128))
    ref2 = reference(y1, y2, w1_t, b1, w2_t, b2)
    assert out2.shape == (B2,)
    assert jnp.allclose(out2, ref2, atol=1e-5, rtol=1e-5), (out2, ref2)

    print("KERNEL_OK")
</pallas_src>

<mosaic_0001>
module attributes {stable_mosaic.version = 11 : i64} {
  func.func @siamese_kernel(%arg0: i32, %arg1: memref<128x128xf32, #tpu.memory_space<vmem>>, %arg2: memref<128x128xf32, #tpu.memory_space<vmem>>, %arg3: memref<256x64xf32, #tpu.memory_space<vmem>>, %arg4: memref<1x64xf32, #tpu.memory_space<vmem>>, %arg5: memref<8x64xf32, #tpu.memory_space<vmem>>, %arg6: memref<1xf32, #tpu.memory_space<smem>>, %arg7: memref<1x1x128xf32, #tpu.memory_space<vmem>>) attributes {dimension_semantics = [#tpu.dimension_semantics<parallel>], iteration_bounds = array<i64: 1>, scalar_prefetch = 0 : i64, scratch_operands = 0 : i64, tpu.core_type = #tpu.core_type<tc>, window_params = [{transform_indices = @transform_0, window_bounds = array<i64: 128, 128>}, {transform_indices = @transform_1, window_bounds = array<i64: 128, 128>}, {pipeline_mode = #tpu.pipeline_mode<synchronous>, transform_indices = @transform_2, window_bounds = array<i64: 256, 64>}, {pipeline_mode = #tpu.pipeline_mode<synchronous>, transform_indices = @transform_3, window_bounds = array<i64: 1, 64>}, {pipeline_mode = #tpu.pipeline_mode<synchronous>, transform_indices = @transform_4, window_bounds = array<i64: 8, 64>}, {transform_indices = @transform_5, window_bounds = array<i64: 1>}, {transform_indices = @transform_6, window_bounds = array<i64: 1, 1, 128>}]} {
    %c0 = arith.constant 0 : index
    %c0_0 = arith.constant 0 : index
    %0 = vector.load %arg1[%c0, %c0_0] : memref<128x128xf32, #tpu.memory_space<vmem>>, vector<128x128xf32>
    %c0_1 = arith.constant 0 : index
    %c0_2 = arith.constant 0 : index
    %1 = vector.load %arg2[%c0_1, %c0_2] : memref<128x128xf32, #tpu.memory_space<vmem>>, vector<128x128xf32>
    %2 = arith.subf %0, %1 : vector<128x128xf32>
    %3 = arith.mulf %2, %2 : vector<128x128xf32>
    %4 = tpu.concatenate %2, %3 in 1 : vector<128x128xf32>, vector<128x128xf32> -> vector<128x256xf32>
    %c0_3 = arith.constant 0 : index
    %c0_4 = arith.constant 0 : index
    %5 = vector.load %arg3[%c0_3, %c0_4] : memref<256x64xf32, #tpu.memory_space<vmem>>, vector<256x64xf32>
    %cst = arith.constant dense<0.000000e+00> : vector<128x64xf32>
    %6 = tpu.matmul %4, %5, %cst {dimension_numbers = #tpu.dot_dimension_numbers<[1], [0], [0], [1], [0, 0, 1, 1], [], []>} : vector<128x256xf32>, vector<256x64xf32>, vector<128x64xf32> -> vector<128x64xf32>
    %c0_5 = arith.constant 0 : index
    %c0_6 = arith.constant 0 : index
    %7 = vector.load %arg4[%c0_5, %c0_6] : memref<1x64xf32, #tpu.memory_space<vmem>>, vector<1x64xf32>
    %8 = vector.broadcast %7 : vector<1x64xf32> to vector<128x64xf32>
    %9 = arith.addf %6, %8 : vector<128x64xf32>
    %cst_7 = arith.constant 0.000000e+00 : f32
    %10 = vector.broadcast %cst_7 : f32 to vector<128x64xf32>
    %11 = arith.maximumf %9, %10 : vector<128x64xf32>
    %c0_8 = arith.constant 0 : index
    %c0_9 = arith.constant 0 : index
    %12 = vector.load %arg5[%c0_8, %c0_9] : memref<8x64xf32, #tpu.memory_space<vmem>>, vector<8x64xf32>
    %cst_10 = arith.constant dense<0.000000e+00> : vector<8x128xf32>
    %13 = tpu.matmul %12, %11, %cst_10 {dimension_numbers = #tpu.dot_dimension_numbers<[1], [1], [0], [0], [0, 0, 1, 0], [], []>} : vector<8x64xf32>, vector<128x64xf32>, vector<8x128xf32> -> vector<8x128xf32>
    %14 = vector.extract_strided_slice %13 {offsets = [0, 0], sizes = [1, 128], strides = [1, 1]} : vector<8x128xf32> to vector<1x128xf32>
    %c0_11 = arith.constant 0 : index
    %15 = memref.load %arg6[%c0_11] : memref<1xf32, #tpu.memory_space<smem>>
    %16 = vector.broadcast %15 : f32 to vector<1x128xf32>
    %17 = arith.addf %14, %16 : vector<1x128xf32>
    %18 = arith.negf %17 : vector<1x128xf32>
    %19 = math.exp %18 : vector<1x128xf32>
    %cst_12 = arith.constant 1.000000e+00 : f32
    %20 = vector.broadcast %cst_12 : f32 to vector<1x128xf32>
    %21 = arith.addf %20, %19 : vector<1x128xf32>
    %22 = arith.divf %20, %21 : vector<1x128xf32>
    %23 = vector.shape_cast %22 : vector<1x128xf32> to vector<1x1x128xf32>
    %c0_13 = arith.constant 0 : index
    %c0_14 = arith.constant 0 : index
    %c0_15 = arith.constant 0 : index
    %24 = vector.load %arg7[%c0_13, %c0_14, %c0_15] : memref<1x1x128xf32, #tpu.memory_space<vmem>>, vector<1x1x128xf32>
    tpu.vector_store %arg7[%c0_13, %c0_14, %c0_15], %23 {strides = array<i32>} : memref<1x1x128xf32, #tpu.memory_space<vmem>>, vector<1x1x128xf32>,
    return
  }
  func.func @transform_0(%arg0: i32) -> (i32, i32) {
    %c0_i32 = arith.constant 0 : i32
    %c0_i32_0 = arith.constant 0 : i32
    return %arg0, %c0_i32 : i32, i32
  }
  func.func @transform_1(%arg0: i32) -> (i32, i32) {
    %c0_i32 = arith.constant 0 : i32
    %c0_i32_0 = arith.constant 0 : i32
    return %arg0, %c0_i32 : i32, i32
  }
  func.func @transform_2(%arg0: i32) -> (i32, i32) {
    %c0_i32 = arith.constant 0 : i32
    %c0_i32_0 = arith.constant 0 : i32
    %c0_i32_1 = arith.constant 0 : i32
    return %c0_i32, %c0_i32_0 : i32, i32
  }
  func.func @transform_3(%arg0: i32) -> (i32, i32) {
    %c0_i32 = arith.constant 0 : i32
    %c0_i32_0 = arith.constant 0 : i32
    %c0_i32_1 = arith.constant 0 : i32
    return %c0_i32, %c0_i32_0 : i32, i32
  }
  func.func @transform_4(%arg0: i32) -> (i32, i32) {
    %c0_i32 = arith.constant 0 : i32
    %c0_i32_0 = arith.constant 0 : i32
    %c0_i32_1 = arith.constant 0 : i32
    return %c0_i32, %c0_i32_0 : i32, i32
  }
  func.func @transform_5(%arg0: i32) -> i32 {
    %c0_i32 = arith.constant 0 : i32
    %c0_i32_0 = arith.constant 0 : i32
    return %c0_i32 : i32
  }
  func.func @transform_6(%arg0: i32) -> (i32, i32, i32) {
    %c0_i32 = arith.constant 0 : i32
    %c0_i32_0 = arith.constant 0 : i32
    %c0_i32_1 = arith.constant 0 : i32
    return %arg0, %c0_i32, %c0_i32_0 : i32, i32, i32
  }
}

</mosaic_0001>

<bundles_post_ra>
// kernel: tpu_custom_call.1
= control target key start
LH: loop header
LB: loop body
LE: loop exit
PB: predicated region body
PF: predicated region fallthrough
CT: control target
= control target key end

     0   :  { %s742_s0 = inlined_call_operand.vmem [shape: f32[8,128], index: 0, kind: input, shape index: {}]   ;;  %s743_s1 = inlined_call_operand.vmem [shape: f32[8,128], index: 1, kind: input, shape index: {}]   ;;  %s744_s2 = inlined_call_operand.vmem [shape: f32[256,64], index: 2, kind: input, shape index: {}]   ;;  %s745_s3 = inlined_call_operand.vmem [shape: f32[1,64], index: 3, kind: input, shape index: {}]   ;;  %s746_s4 = inlined_call_operand.vmem [shape: f32[8,64], index: 4, kind: input, shape index: {}]   ;;  %s747_s5 = inlined_call_operand.<no memory space> [shape: f32[1], index: 5, kind: input, shape index: {}]   ;;  %s748_s6 = inlined_call_operand.hbm [shape: f32[1,1,128], index: 6, kind: output, shape index: {}]  }
   0x1   :  { %v104_v0 = vld [vmem:[%s744_s2 + $0x78] sm:$0xff]  ;;  %v103_v2 = vld [vmem:[%s744_s2 + $0x70] sm:$0xff]  ;;  %v102_v4 = vld [vmem:[%s744_s2 + $0x68] sm:$0xff] }
   0x2   :  { %v120_v1 = vld [vmem:[%s744_s2 + $0xf8] sm:$0xff]  ;;  %125 = vmatpush.msra.mxu0 %v104_v0  ;;  %v119_v3 = vld [vmem:[%s744_s2 + $0xf0] sm:$0xff]  ;;  %v118_v5 = vld [vmem:[%s744_s2 + $0xe8] sm:$0xff]  ;;  %401 = vmatpush.msra.mxu3 %v104_v0 }
   0x3   :  { %190 = vmatpush.msra.mxu1 %v120_v1  ;;  %v101_v6 = vld [vmem:[%s744_s2 + $0x60] sm:$0xff]  ;;  %v100_v8 = vld [vmem:[%s744_s2 + $0x58] sm:$0xff]  ;;  %v99_v10 = vld [vmem:[%s744_s2 + $0x50] sm:$0xff] }
   0x4   :  { %126 = vmatpush.msra.mxu0 %v103_v2  ;;  %v117_v7 = vld [vmem:[%s744_s2 + $0xe0] sm:$0xff]  ;;  %402 = vmatpush.msra.mxu3 %v103_v2  ;;  %v116_v9 = vld [vmem:[%s744_s2 + $0xd8] sm:$0xff]  ;;  %v115_v11 = vld [vmem:[%s744_s2 + $0xd0] sm:$0xff] }
   0x5   :  { %191 = vmatpush.msra.mxu1 %v119_v3  ;;  %v98_v12 = vld [vmem:[%s744_s2 + $0x48] sm:$0xff]  ;;  %v97_v14 = vld [vmem:[%s744_s2 + $0x40] sm:$0xff] }
   0x6   :  { %127 = vmatpush.msra.mxu0 %v102_v4  ;;  %403 = vmatpush.msra.mxu3 %v102_v4  ;;  %v114_v13 = vld [vmem:[%s744_s2 + $0xc8] sm:$0xff]  ;;  %v113_v15 = vld [vmem:[%s744_s2 + $0xc0] sm:$0xff] }
   0x7   :  { %192 = vmatpush.msra.mxu1 %v118_v5 }
   0x8   :  { %128 = vmatpush.msra.mxu0 %v101_v6  ;;  %404 = vmatpush.msra.mxu3 %v101_v6 }
   0x9   :  { %193 = vmatpush.msra.mxu1 %v117_v7 }
   0xa   :  { %129 = vmatpush.msra.mxu0 %v100_v8  ;;  %405 = vmatpush.msra.mxu3 %v100_v8 }
   0xb   :  { %194 = vmatpush.msra.mxu1 %v116_v9 }
   0xc   :  { %130 = vmatpush.msra.mxu0 %v99_v10  ;;  %406 = vmatpush.msra.mxu3 %v99_v10 }
   0xd   :  { %195 = vmatpush.msra.mxu1 %v115_v11 }
   0xe   :  { %131 = vmatpush.msra.mxu0 %v98_v12 }
   0xf   :  { %196 = vmatpush.msra.mxu1 %v114_v13 }
  0x10   :  { %12 = vsyncpa [#allocation4], 0  ;;  %v96_v16 = vld [vmem:[%s744_s2 + $0x38] sm:$0xff]  ;;  %407 = vmatpush.msra.mxu3 %v98_v12  ;;  %132 = vmatpush.msra.mxu0 %v97_v14  ;;  %v95_v18 = vld [vmem:[%s744_s2 + $0x30] sm:$0xff]  ;;  %vm272_vm0 = vcmask 523264  }
  0x11   :  { %v112_v17 = vld [vmem:[%s744_s2 + $0xb8] sm:$0xff]  ;;  %197 = vmatpush.msra.mxu1 %v113_v15  ;;  %v111_v19 = vld [vmem:[%s744_s2 + $0xb0] sm:$0xff]  ;;  %v94_v20 = vld [vmem:[%s744_s2 + $0x28] sm:$0xff] }
  0x12   :  { %408 = vmatpush.msra.mxu3 %v97_v14  ;;  %133 = vmatpush.msra.mxu0 %v96_v16  ;;  %v110_v21 = vld [vmem:[%s744_s2 + $0xa8] sm:$0xff]  ;;  %v93_v22 = vld [vmem:[%s744_s2 + $0x20] sm:$0xff]  ;;  %v92_v26 = vld [vmem:[%s744_s2 + $0x18] sm:$0xff] }
  0x13   :  { %198 = vmatpush.msra.mxu1 %v112_v17  ;;  %v109_v23 = vld [vmem:[%s744_s2 + $0xa0] sm:$0xff]  ;;  %v108_v27 = vld [vmem:[%s744_s2 + $0x98] sm:$0xff]  ;;  %v91_v28 = vld [vmem:[%s744_s2 + $0x10] sm:$0xff] }
  0x14   :  { %409 = vmatpush.msra.mxu3 %v96_v16  ;;  %134 = vmatpush.msra.mxu0 %v95_v18  ;;  %v25_v24 = vld [vmem:[%s742_s0] sm:$0xff]  ;;  %v107_v29 = vld [vmem:[%s744_s2 + $0x90] sm:$0xff]  ;;  %v90_v31 = vld [vmem:[%s744_s2 + $0x8] sm:$0xff] }
  0x15   :  { %199 = vmatpush.msra.mxu1 %v111_v19  ;;  %v41_v25 = vld [vmem:[%s743_s1] sm:$0xff]  ;;  %v106_v32 = vld [vmem:[%s744_s2 + $0x88] sm:$0xff]  ;;  %v27_v40 = vld [vmem:[%s742_s0 + $0x10] sm:$0xff] }
  0x16   :  { %410 = vmatpush.msra.mxu3 %v95_v18  ;;  %135 = vmatpush.msra.mxu0 %v94_v20  ;;  %v57_v30 = vsub.f32 %v25_v24, %v41_v25  ;;  %v89_v33 = vld [vmem:[%s744_s2] sm:$0xff]  ;;  %v26_v36 = vld [vmem:[%s742_s0 + $0x8] sm:$0xff]  ;;  %v43_v41 = vld [vmem:[%s743_s1 + $0x10] sm:$0xff] }
  0x17   :  { %200 = vmatpush.msra.mxu1 %v110_v21  ;;  %v105_v34 = vld [vmem:[%s744_s2 + $0x80] sm:$0xff]  ;;  %v42_v37 = vld [vmem:[%s743_s1 + $0x8] sm:$0xff]  ;;  %v59_v42 = vsub.f32 %v27_v40, %v43_v41  ;;  %v28_v44 = vld [vmem:[%s742_s0 + $0x18] sm:$0xff] }
  0x18   :  { %411 = vmatpush.msra.mxu3 %v94_v20  ;;  %136 = vmatpush.msra.mxu0 %v93_v22  ;;  %v73_v35 = vmul.f32 %v57_v30, %v57_v30  ;;  %v58_v38 = vsub.f32 %v26_v36, %v42_v37  ;;  %v44_v45 = vld [vmem:[%s743_s1 + $0x18] sm:$0xff]  ;;  %v29_v48 = vld [vmem:[%s742_s0 + $0x20] sm:$0xff]  ;;  %v30_v52 = vld [vmem:[%s742_s0 + $0x28] sm:$0xff] }
  0x19   :  { %201 = vmatpush.msra.mxu1 %v109_v23  ;;  %v75_v43 = vmul.f32 %v59_v42, %v59_v42  ;;  %v60_v46 = vsub.f32 %v28_v44, %v44_v45  ;;  %v45_v49 = vld [vmem:[%s743_s1 + $0x20] sm:$0xff]  ;;  %v46_v53 = vld [vmem:[%s743_s1 + $0x28] sm:$0xff]  ;;  %v31_v56 = vld [vmem:[%s742_s0 + $0x30] sm:$0xff] }
  0x1a   :  { %412 = vmatpush.msra.mxu3 %v93_v22  ;;  %137 = vmatpush.msra.mxu0 %v92_v26  ;;  %v74_v39 = vmul.f32 %v58_v38, %v58_v38  ;;  %v61_v50 = vsub.f32 %v29_v48, %v45_v49  ;;  %v62_v54 = vsub.f32 %v30_v52, %v46_v53  ;;  %v47_v57 = vld [vmem:[%s743_s1 + $0x30] sm:$0xff]  ;;  %v36_v62 = vld [vmem:[%s742_s0 + $0x58] sm:$0xff]  ;;  %v37_v5 = vld [vmem:[%s742_s0 + $0x60] sm:$0xff] }
  0x1b   :  { %202 = vmatpush.msra.mxu1 %v108_v27  ;;  %v76_v47 = vmul.f32 %v60_v46, %v60_v46  ;;  %v35_v58 = vld [vmem:[%s742_s0 + $0x50] sm:$0xff]  ;;  %v63_v61 = vsub.f32 %v31_v56, %v47_v57  ;;  %v52_v63 = vld [vmem:[%s743_s1 + $0x58] sm:$0xff]  ;;  %v53_v6 = vld [vmem:[%s743_s1 + $0x60] sm:$0xff] }
  0x1c   :  { %413 = vmatpush.msra.mxu3 %v92_v26  ;;  %138 = vmatpush.msra.mxu0 %v91_v28  ;;  %v77_v51 = vmul.f32 %v61_v50, %v61_v50  ;;  %v78_v55 = vmul.f32 %v62_v54, %v62_v54  ;;  %v51_v59 = vld [vmem:[%s743_s1 + $0x50] sm:$0xff]  ;;  %v32_v1 = vld [vmem:[%s742_s0 + $0x38] sm:$0xff]  ;;  %v68_v3 = vsub.f32 %v36_v62, %v52_v63  ;;  %v33_v8 = vld [vmem:[%s742_s0 + $0x40] sm:$0xff] }
  0x1d   :  { %203 = vmatpush.msra.mxu1 %v107_v29  ;;  %v67_v60 = vsub.f32 %v35_v58, %v51_v59  ;;  %v79_v0 = vmul.f32 %v63_v61, %v63_v61  ;;  %v48_v2 = vld [vmem:[%s743_s1 + $0x38] sm:$0xff]  ;;  %v49_v9 = vld [vmem:[%s743_s1 + $0x40] sm:$0xff]  ;;  %v69_v10 = vsub.f32 %v37_v5, %v53_v6  ;;  %v38_v12 = vld [vmem:[%s742_s0 + $0x68] sm:$0xff] }
  0x1e   :  { %414 = vmatpush.msra.mxu3 %v91_v28  ;;  %139 = vmatpush.msra.mxu0 %v90_v31  ;;  %v64_v4 = vsub.f32 %v32_v1, %v48_v2  ;;  %v65_v11 = vsub.f32 %v33_v8, %v49_v9  ;;  %v54_v13 = vld [vmem:[%s743_s1 + $0x68] sm:$0xff]  ;;  %v39_v19 = vld [vmem:[%s742_s0 + $0x70] sm:$0xff]  ;;  %v40_v23 = vld [vmem:[%s742_s0 + $0x78] sm:$0xff]  ;;  %v84_v27 = vmul.f32 %v68_v3, %v68_v3 }
  0x1f   :  { %204 = vmatpush.msra.mxu1 %v106_v32  ;;  %v34_v15 = vld [vmem:[%s742_s0 + $0x48] sm:$0xff]  ;;  %v70_v17 = vsub.f32 %v38_v12, %v54_v13  ;;  %v55_v20 = vld [vmem:[%s743_s1 + $0x70] sm:$0xff]  ;;  %v56_v24 = vld [vmem:[%s743_s1 + $0x78] sm:$0xff]  ;;  %v83_v25 = vmul.f32 %v67_v60, %v67_v60  ;;  %v85_v28 = vmul.f32 %v69_v10, %v69_v10 }
  0x20   :  { %415 = vmatpush.msra.mxu3 %v90_v31  ;;  %140 = vmatpush.msra.mxu0 %v89_v33  ;;  %v80_v7 = vmul.f32 %v64_v4, %v64_v4  ;;  %v81_v14 = vmul.f32 %v65_v11, %v65_v11  ;;  %v50_v16 = vld [vmem:[%s743_s1 + $0x48] sm:$0xff]  ;;  %v71_v22 = vsub.f32 %v39_v19, %v55_v20  ;;  %v680_v32 = vld [vmem:[%s745_s3] ss:$0 sm:$0xff] }
  0x21   :  { %205 = vmatpush.msra.mxu1 %v105_v34  ;;  %141 = vmatmul.f32.vlgmr.msra.gmra.mxu0 %v57_v30  ;;  %v66_v18 = vsub.f32 %v34_v15, %v50_v16  ;;  %v72_v26 = vsub.f32 %v40_v23, %v56_v24  ;;  %v86_v29 = vmul.f32 %v70_v17, %v70_v17 }
  0x22   :  { %206 = vmatmul.f32.vlgmr.msra.gmra.mxu1 %v73_v35  ;;  %416 = vmatpush.msra.mxu3 %v89_v33  ;;  %v87_v30 = vmul.f32 %v71_v22, %v71_v22 }
  0x23   :  { %171 = vmatmul.f32.vlgmr.msra.gmra.mxu3 %v67_v60  ;;  %v82_v21 = vmul.f32 %v66_v18, %v66_v18  ;;  %v88_v31 = vmul.f32 %v72_v26, %v72_v26 }
  0x29   :  { %144 = vmatmul.f32.gmra.mxu0 %v58_v38 }
  0x2a   :  { %209 = vmatmul.f32.gmra.mxu1 %v74_v39 }
  0x2b   :  { %174 = vmatmul.f32.gmra.mxu3 %v68_v3 }
  0x31   :  { %147 = vmatmul.f32.gmra.mxu0 %v59_v42 }
  0x32   :  { %212 = vmatmul.f32.gmra.mxu1 %v75_v43 }
  0x33   :  { %177 = vmatmul.f32.gmra.mxu3 %v69_v10 }
  0x39   :  { %150 = vmatmul.f32.gmra.mxu0 %v60_v46 }
  0x3a   :  { %215 = vmatmul.f32.gmra.mxu1 %v76_v47 }
  0x3b   :  { %180 = vmatmul.f32.gmra.mxu3 %v70_v17 }
  0x41   :  { %153 = vmatmul.f32.gmra.mxu0 %v61_v50 }
  0x42   :  { %218 = vmatmul.f32.gmra.mxu1 %v77_v51 }
  0x43   :  { %183 = vmatmul.f32.gmra.mxu3 %v71_v22 }
  0x49   :  { %156 = vmatmul.f32.gmra.mxu0 %v62_v54 }
  0x4a   :  { %221 = vmatmul.f32.gmra.mxu1 %v78_v55 }
  0x4b   :  { %186 = vmatmul.f32.gmra.mxu3 %v72_v26 }
  0x51   :  { %159 = vmatmul.f32.gmra.mxu0 %v63_v61 }
  0x52   :  { %224 = vmatmul.f32.gmra.mxu1 %v79_v0 }
  0x59   :  { %162 = vmatmul.f32.gmra.mxu0 %v64_v4 }
  0x5a   :  { %227 = vmatmul.f32.gmra.mxu1 %v80_v7 }
  0x61   :  { %165 = vmatmul.f32.gmra.mxu0 %v65_v11 }
  0x62   :  { %230 = vmatmul.f32.gmra.mxu1 %v81_v14 }
  0x69   :  { %168 = vmatmul.f32.gmra.mxu0 %v66_v18 }
  0x6a   :  { %233 = vmatmul.f32.gmra.mxu1 %v82_v21 }
  0x72   :  { %236 = vmatmul.f32.gmra.mxu1 %v83_v25 }
  0x7a   :  { %239 = vmatmul.f32.gmra.mxu1 %v84_v27 }
  0x82   :  { %242 = vmatmul.f32.gmra.mxu1 %v85_v28 }
  0x8a   :  { %245 = vmatmul.f32.gmra.mxu1 %v86_v29 }
  0x92   :  { %248 = vmatmul.f32.gmra.mxu1 %v87_v30 }
  0x9a   :  { %251 = vmatmul.f32.gmra.mxu1 %v88_v31 }
  0x9e   :  { %v142_v33 = vpop.f32.mrf.mxu0 }
  0x9f   :  { %v207_v34 = vpop.f32.mrf.mxu1  ;;  %v143_v35 = vadd.f32 %v680_v32, %v142_v33 }
  0xa1   :  { %v683_v36 = vadd.f32 %v207_v34, %v143_v35 }
  0xa6   :  { %v145_v37 = vpop.f32.mrf.mxu0  ;;  %v172_v54 = vpop.f32.mrf.mxu3 }
  0xa7   :  { %v210_v38 = vpop.f32.mrf.mxu1  ;;  %v146_v39 = vadd.f32 %v680_v32, %v145_v37  ;;  %v173_v20 = vadd.f32 %v680_v32, %v172_v54 }
  0xa9   :  { %v686_v40 = vadd.f32 %v210_v38, %v146_v39 }
  0xae   :  { %v148_v41 = vpop.f32.mrf.mxu0  ;;  %v175_v56 = vpop.f32.mrf.mxu3 }
  0xaf   :  { %v213_v42 = vpop.f32.mrf.mxu1  ;;  %v149_v43 = vadd.f32 %v680_v32, %v148_v41  ;;  %v176_v17 = vadd.f32 %v680_v32, %v175_v56 }
  0xb1   :  { %v689_v44 = vadd.f32 %v213_v42, %v149_v43 }
  0xb6   :  { %v151_v45 = vpop.f32.mrf.mxu0  ;;  %v178_v58 = vpop.f32.mrf.mxu3 }
  0xb7   :  { %v216_v46 = vpop.f32.mrf.mxu1  ;;  %v152_v47 = vadd.f32 %v680_v32, %v151_v45  ;;  %v179_v14 = vadd.f32 %v680_v32, %v178_v58 }
  0xb9   :  { %v692_v48 = vadd.f32 %v216_v46, %v152_v47 }
  0xbe   :  { %v154_v59 = vpop.f32.mrf.mxu0  ;;  %v181_v61 = vpop.f32.mrf.mxu3 }
  0xbf   :  { %v694_v49 = vpop.f32.mrf.mxu1  ;;  %v182_v10 = vadd.f32 %v680_v32, %v181_v61  ;;  %v155_v42 = vadd.f32 %v680_v32, %v154_v59 }
  0xc1   :  { %v220_v46 = vadd.f32 %v694_v49, %v155_v42  ;;  %v255_v49 = vmax.f32 %v683_v36, 0.0 }
  0xc6   :  { %v157_v62 = vpop.f32.mrf.mxu0  ;;  %v184_v1 = vpop.f32.mrf.mxu3 }
  0xc7   :  { %v696_v50 = vpop.f32.mrf.mxu1  ;;  %v185_v7 = vadd.f32 %v680_v32, %v184_v1  ;;  %v158_v38 = vadd.f32 %v680_v32, %v157_v62 }
  0xc9   :  { %v223_v43 = vadd.f32 %v696_v50, %v158_v38  ;;  %v271_v50 = vld [vmem:[%s746_s4] sm:$0xff]  ;;  %s449_s4 = smov [#allocation3]  }
  0xca   :  { %s372_s29 = sshll.u32 %s449_s4, 4  ;;  %s373_s29 = int_to_ptr.vmem [resolvable:$true] %s372_s29 }
  0xcb   :  { %v260_v47 = vmax.f32 %v223_v43, 0.0 }
  0xce   :  { %v160_v2 = vpop.f32.mrf.mxu0  ;;  %v187_v4 = vpop.f32.mrf.mxu3 }
  0xcf   :  { %v225_v51 = vpop.f32.mrf.mxu1  ;;  %v188_v6 = vadd.f32 %v680_v32, %v187_v4  ;;  %v161_v34 = vadd.f32 %v680_v32, %v160_v2 }
  0xd1   :  { %v226_v39 = vadd.f32 %v225_v51, %v161_v34  ;;  %v258_v51 = vmax.f32 %v692_v48, 0.0 }
  0xd3   :  { %v261_v45 = vmax.f32 %v226_v39, 0.0 }
  0xd6   :  { %v163_v5 = vpop.f32.mrf.mxu0 }
  0xd7   :  { %v228_v52 = vpop.f32.mrf.mxu1  ;;  %v164_v30 = vadd.f32 %v680_v32, %v163_v5 }
  0xd9   :  { %v229_v35 = vadd.f32 %v228_v52, %v164_v30  ;;  %v259_v52 = vmax.f32 %v220_v46, 0.0 }
  0xdb   :  { %v262_v41 = vmax.f32 %v229_v35, 0.0 }
  0xde   :  { %v166_v13 = vpop.f32.mrf.mxu0 }
  0xdf   :  { %v231_v53 = vpop.f32.mrf.mxu1  ;;  %v167_v27 = vadd.f32 %v680_v32, %v166_v13 }
  0xe1   :  { %v232_v31 = vadd.f32 %v231_v53, %v167_v27  ;;  %v257_v53 = vmax.f32 %v689_v44, 0.0  ;;  %v345_v44 = vstv %s747_s5  ;;  %s374_s5 = sshll.u32 %s748_s6, 4  ;;  %s375_s5 = int_to_ptr.hbm [resolvable:$true] %s374_s5 }
  0xe3   :  { %v263_v37 = vmax.f32 %v232_v31, 0.0 }
  0xe6   :  { %v169_v23 = vpop.f32.mrf.mxu0 }
  0xe7   :  { %v234_v55 = vpop.f32.mrf.mxu1  ;;  %v170_v24 = vadd.f32 %v680_v32, %v169_v23  ;;  %v256_v32 = vmax.f32 %v686_v40, 0.0 }
  0xe9   :  { %v235_v28 = vadd.f32 %v234_v55, %v170_v24 }
  0xeb   :  { %v264_v33 = vmax.f32 %v235_v28, 0.0 }
  0xef   :  { %v237_v57 = vpop.f32.mrf.mxu1 }
  0xf0   :  { %v238_v25 = vadd.f32 %v237_v57, %v173_v20 }
  0xf2   :  { %v265_v29 = vmax.f32 %v238_v25, 0.0 }
  0xf7   :  { %v240_v60 = vpop.f32.mrf.mxu1 }
  0xf8   :  { %v241_v21 = vadd.f32 %v240_v60, %v176_v17 }
  0xfa   :  { %v266_v26 = vmax.f32 %v241_v21, 0.0 }
  0xff   :  { %v243_v63 = vpop.f32.mrf.mxu1 }
 0x100   :  { %v244_v18 = vadd.f32 %v243_v63, %v179_v14 }
 0x102   :  { %v267_v22 = vmax.f32 %v244_v18, 0.0 }
 0x107   :  { %v246_v0 = vpop.f32.mrf.mxu1 }
 0x108   :  { %v247_v15 = vadd.f32 %v246_v0, %v182_v10 }
 0x10a   :  { %v268_v19 = vmax.f32 %v247_v15, 0.0 }
 0x10f   :  { %v249_v3 = vpop.f32.mrf.mxu1 }
 0x110   :  { %v250_v11 = vadd.f32 %v249_v3, %v185_v7 }
 0x112   :  { %v269_v16 = vmax.f32 %v250_v11, 0.0 }
 0x117   :  { %v252_v8 = vpop.f32.mrf.mxu1 }
 0x118   :  { %v253_v9 = vadd.f32 %v252_v8, %v188_v6 }
 0x11a   :  { %v270_v12 = vmax.f32 %v253_v9, 0.0 }
 0x11c   :  { %383 = vmatpush.xpose.msk.msra.mxu2 %vm272_vm0, %v270_v12 }
 0x120   :  { %384 = vmatpush.xpose.msk.msra.mxu2 %vm272_vm0, %v269_v16 }
 0x124   :  { %385 = vmatpush.xpose.msk.msra.mxu2 %vm272_vm0, %v268_v19 }
 0x128   :  { %386 = vmatpush.xpose.msk.msra.mxu2 %vm272_vm0, %v267_v22 }
 0x12c   :  { %387 = vmatpush.xpose.msk.msra.mxu2 %vm272_vm0, %v266_v26 }
 0x130   :  { %388 = vmatpush.xpose.msk.msra.mxu2 %vm272_vm0, %v265_v29 }
 0x134   :  { %389 = vmatpush.xpose.msk.msra.mxu2 %vm272_vm0, %v264_v33 }
 0x138   :  { %390 = vmatpush.xpose.msk.msra.mxu2 %vm272_vm0, %v263_v37 }
 0x13c   :  { %391 = vmatpush.xpose.msk.msra.mxu2 %vm272_vm0, %v262_v41 }
 0x140   :  { %392 = vmatpush.xpose.msk.msra.mxu2 %vm272_vm0, %v261_v45 }
 0x144   :  { %393 = vmatpush.xpose.msk.msra.mxu2 %vm272_vm0, %v260_v47 }
 0x148   :  { %394 = vmatpush.xpose.msk.msra.mxu2 %vm272_vm0, %v259_v52 }
 0x14c   :  { %395 = vmatpush.xpose.msk.msra.mxu2 %vm272_vm0, %v258_v51 }
 0x150   :  { %396 = vmatpush.xpose.msk.msra.mxu2 %vm272_vm0, %v257_v53 }
 0x154   :  { %397 = vmatpush.xpose.msk.msra.mxu2 %vm272_vm0, %v256_v32 }
 0x158   :  { %398 = vmatpush.xpose.msk.msra.mxu2 %vm272_vm0, %v255_v49 }
 0x15b   :  { %399 = vmatmul.msk.f32.vlgmr.msra.gmra.mxu2 %vm272_vm0, %v271_v50 }
 0x1de   :  { %v341_v48 = vpop.f32.mrf.mxu2 }
 0x1df   :  { %v346_v54 = vadd.f32 %v345_v44, %v341_v48 }
 0x1e1   :  { %v400_v55 = vmul.f32 -1.442695, %v346_v54 }
 0x1e3   :  { %419 = vpow2.f32 %v400_v55 }
 0x1e9   :  { %v420_v40 = vpop.eup %419 }
 0x1ea   :  { %v350_v56 = vadd.f32 1.0, %v420_v40 }
 0x1ec   :  { %421 = vrcp.f32 %v350_v56  ;;  %v362_v59 = vand.u32 2147483648, %v350_v56  ;;  %v360_v61 = vand.u32 2147483647, %v350_v56  ;;  %vm356_vm2 = vweird.f32 %v350_v56 }
 0x1ee   :  { %v363_v63 = vor.u32 1.1754944e-38, %v362_v59  ;;  %vm361_vm4 = vcmp.eq.f32.partialorder %v360_v61, 8.507059e+37 }
 0x1f2   :  { %v422_v36 = vpop.eup %421 }
 0x1f3   :  { %v352_v57 = vmul.f32 %v422_v36, %v350_v56  ;;  %vm357_vm1 = vweird.f32 %v422_v36 }
 0x1f4   :  { %vm358_vm3 = vmor %vm356_vm2, %vm357_vm1 }
 0x1f5   :  { %v353_v58 = vsub.f32 1.0, %v352_v57 }
 0x1f7   :  { %v354_v60 = vmul.f32 %v422_v36, %v353_v58 }
 0x1f9   :  { %v355_v62 = vadd.f32 %v422_v36, %v354_v60 }
 0x1fb   :  { %v359_v0 = vsel %vm358_vm3, %v422_v36, %v355_v62 }
 0x1fc   :  { %v364_v1 = vsel %vm361_vm4, %v363_v63, %v359_v0 }
 0x1fd   :  { %366 = vst [vmem:[#allocation3] sm:$0x1] %v364_v1 }
 0x1fe   :  { %377 = dma.vmem_to_hbm [thread:$0]  %s373_s29, 16, %s375_s5, [#allocation4]  }
 0x1ff   :  { %447 = dma.done.wait [#allocation4], 16  }
 0x200   :  { %448 = vsyncadd [#allocation4], 4294967280 }
 0x201   :  { %382 = vsyncpa [#allocation4], 1 }

</bundles_post_ra>
